<compile_context>
chip_gen: v6e
topology: v6e:2x2x1
jax: 0.10.0
libtpu: 0.0.40
codegen_flags: <defaults>
</compile_context>

<pallas_src>
import functools

import jax
import jax.numpy as jnp
from jax.experimental import pallas as pl
from jax.experimental.pallas import tpu as pltpu


def _round_up(x, m):
    return ((x + m - 1) // m) * m


def _pad_axis(x, axis, target):
    pad = target - x.shape[axis]
    if pad <= 0:
        return x
    widths = [(0, 0)] * x.ndim
    widths[axis] = (0, pad)
    return jnp.pad(x, widths)


def _sigmoid(x):
    # Exact identity sigmoid(x) = 0.5*(tanh(x/2)+1): a single EUP op per element.
    return 0.5 * (jnp.tanh(0.5 * x) + 1.0)


def _din_kernel(q_ref, ub_ref, len_ref,
                w1_ref, b1_ref, w2_ref, b2_ref, w3_ref, b3_ref,
                out_ref):
    BB, T, E = ub_ref.shape
    H1p = w1_ref.shape[2]

    q = q_ref[...]                                    # (BB, E)    bf16
    ub3 = ub_ref[...]                                 # (BB, T, E) bf16
    ubf = ub3.reshape(BB * T, E)

    # fc1 with pre-split W1 (no (T, 4E) concat); query term computed once per row.
    qh = jnp.dot(q, w1_ref[0], preferred_element_type=jnp.float32)        # (BB, H1p)
    uh = jnp.dot(ubf, w1_ref[1], preferred_element_type=jnp.float32)      # (BB*T, H1p)
    prod = (q[:, None, :] * ub3).reshape(BB * T, E)                       # queries * ub
    ph = jnp.dot(prod, w1_ref[2], preferred_element_type=jnp.float32)     # (BB*T, H1p)
    h1 = _sigmoid(uh.reshape(BB, T, H1p) + ph.reshape(BB, T, H1p)
                  + qh[:, None, :] + b1_ref[...])                         # f32

    # fc2 (single-pass bf16 MXU matmul, f32 accumulate, f32 sigmoid).
    h2 = _sigmoid(jnp.dot(h1.reshape(BB * T, H1p).astype(jnp.bfloat16),
                          w2_ref[...], preferred_element_type=jnp.float32)
                  + b2_ref[...])                                          # (BB*T, H2p)

    # fc3: N=1 matmul replaced by VPU multiply + lane reduce (MXU stays free).
    s = jnp.sum(h2 * w3_ref[...], axis=-1, keepdims=True) + b3_ref[...]   # (BB*T, 1)
    s3 = s.reshape(BB, T, 1)

    # mask * score, then softmax over T (matches reference: softmax(score * mask)).
    idx = jax.lax.broadcasted_iota(jnp.int32, (BB, T, 1), 1)
    mask = (idx < len_ref[...]).astype(jnp.float32)                       # (BB, T, 1)
    masked = s3 * mask
    m = jnp.max(masked, axis=1, keepdims=True)
    e = jnp.exp(masked - m)
    inv = pl.reciprocal(jnp.sum(e, axis=1, keepdims=True), approx=True)
    sm = e * inv                                                          # (BB, T, 1)

    # output = softmax-weights @ user_behavior  ==  sum_t sm[:, t] * ub[:, t, :]
    out_ref[...] = jnp.sum(sm * ub3.astype(jnp.float32), axis=1).astype(out_ref.dtype)


@functools.partial(jax.jit, static_argnames=("block_b",))
def din_attention(query_ad, user_behavior, user_behavior_length, params, block_b=None):
    """query_ad (B,E), user_behavior (B,T,E), user_behavior_length (B,1) int -> (B,1,E)."""
    W1, b1, W2, b2, W3, b3 = params
    B, T, E = user_behavior.shape
    H1 = W1.shape[1]
    H2 = W2.shape[1]
    H1p = _round_up(H1, 128)   # lane-dense fc1/fc2 weight tiles (MXU N dim)
    H2p = _round_up(H2, 128)

    if block_b is None:
        block_b = 256          # BB*T = 2048 MLP rows / step; fits v5e's 16 MiB scoped VMEM
    BB = min(_round_up(block_b, 8), _round_up(B, 8))
    # Keep >= 2 grid steps when the batch allows it so the "parallel" axis can be
    # sharded across both TensorCores on v7x (no-op on single-TC v5e/v6e).
    if B > 8 and pl.cdiv(B, BB) < 2:
        BB = max(8, _round_up(pl.cdiv(B, 2), 8))
    nb = pl.cdiv(B, BB)        # clipped tail block instead of a full-array jnp.pad

    # Pre-split / zero-pad / cast the weights (exact: padded W2 rows, W3 cols are zero).
    w1q = _pad_axis(W1[:E] + W1[2 * E:3 * E], 1, H1p)       # (E, H1p)
    w1u = _pad_axis(W1[E:2 * E] - W1[2 * E:3 * E], 1, H1p)  # (E, H1p)
    w1p = _pad_axis(W1[3 * E:], 1, H1p)                     # (E, H1p)
    w1s = jnp.stack([w1q, w1u, w1p]).astype(jnp.bfloat16)   # (3, E, H1p)
    b1p = _pad_axis(b1.reshape(1, H1), 1, H1p)              # (1, H1p)  f32
    w2p = _pad_axis(_pad_axis(W2, 0, H1p), 1, H2p).astype(jnp.bfloat16)  # (H1p, H2p)
    b2p = _pad_axis(b2.reshape(1, H2), 1, H2p)              # (1, H2p)  f32
    w3r = _pad_axis(W3.reshape(H2, 1).T, 1, H2p)            # (1, H2p)  f32
    b3p = b3.reshape(1, 1)                                  # (1, 1)    f32

    q = query_ad.astype(jnp.bfloat16)
    ub = user_behavior.astype(jnp.bfloat16)
    lens = user_behavior_length.reshape(B, 1, 1).astype(jnp.int32)

    out = pl.pallas_call(
        _din_kernel,
        out_shape=jax.ShapeDtypeStruct((nb * BB, E), jnp.float32),
        grid=(nb,),
        in_specs=[
            pl.BlockSpec((BB, E), lambda i: (i, 0)),          # query block
            pl.BlockSpec((BB, T, E), lambda i: (i, 0, 0)),    # behavior block
            pl.BlockSpec((BB, 1, 1), lambda i: (i, 0, 0)),    # lengths block
            pl.BlockSpec((3, E, H1p), lambda i: (0, 0, 0)),   # stacked pre-split W1
            pl.BlockSpec((1, H1p), lambda i: (0, 0)),         # b1
            pl.BlockSpec((H1p, H2p), lambda i: (0, 0)),       # W2
            pl.BlockSpec((1, H2p), lambda i: (0, 0)),         # b2
            pl.BlockSpec((1, H2p), lambda i: (0, 0)),         # W3 row
            pl.BlockSpec((1, 1), lambda i: (0, 0)),           # b3
        ],
        out_specs=pl.BlockSpec((BB, E), lambda i: (i, 0)),    # sublane-dense 2D output
        compiler_params=pltpu.CompilerParams(
            dimension_semantics=("parallel",)),
    )(q, ub, lens, w1s, b1p, w2p, b2p, w3r, b3p)

    return out[:B].reshape(B, 1, E)


def init_params(key, embedding_dim=36, hidden=(80, 40, 1)):
    """Deterministic Linear params. Weights stored as (in, out) so x @ W + b."""
    d_in = 4 * embedding_dim
    sizes = [(d_in, hidden[0]), (hidden[0], hidden[1]), (hidden[1], hidden[2])]
    params = []
    for i, (fi, fo) in enumerate(sizes):
        kw, kb = jax.random.split(jax.random.fold_in(key, i))
        bound = 1.0 / jnp.sqrt(fi)
        W = jax.random.uniform(kw, (fi, fo), jnp.float32, -bound, bound)
        b = jax.random.uniform(kb, (1, fo), jnp.float32, -bound, bound)
        params.extend([W, b])
    return tuple(params)


def din_reference(query_ad, user_behavior, user_behavior_length, params):
    """Pure-JAX transliteration of the PyTorch forward (length shape (B,1))."""
    W1, b1, W2, b2, W3, b3 = params
    B, T, E = user_behavior.shape
    queries = jnp.repeat(query_ad[:, None, :], T, axis=1)
    ai = jnp.concatenate(
        [queries, user_behavior, queries - user_behavior, queries * user_behavior],
        axis=-1)
    h1 = jax.nn.sigmoid(ai @ W1 + b1)
    h2 = jax.nn.sigmoid(h1 @ W2 + b2)
    s = h2 @ W3 + b3                                    # (B, T, 1)
    att = jnp.transpose(s, (0, 2, 1))                   # (B, 1, T)
    mask = (jnp.arange(T)[None, :]
            < user_behavior_length[:, None]).astype(jnp.float32)   # (B, 1, T)
    score = jax.nn.softmax(att * mask, axis=-1)
    return score @ user_behavior                        # (B, 1, E)


if __name__ == "__main__":
    B, T, E = 2, 8, 36   # embedding_dim=36 as in DinAttentionLayer.__init__
    key = jax.random.PRNGKey(0)
    kq, ku = jax.random.split(key)

    query_ad = jax.random.normal(kq, (B, E), jnp.float32)
    user_behavior = jax.random.normal(ku, (B, T, E), jnp.float32)
    user_behavior_length = jnp.array([[5], [3]], dtype=jnp.int32)   # (B, 1)

    params = init_params(jax.random.PRNGKey(42), embedding_dim=E)

    out = din_attention(query_ad, user_behavior, user_behavior_length, params)
    out = jax.block_until_ready(out)

    ref = din_reference(query_ad, user_behavior, user_behavior_length, params)
    assert out.shape == (B, 1, E)
    # Tolerance note: inputs/weights stream as bf16 (f32 accumulation / elementwise),
    # fc1 is algebraically pre-split, fc3 is a VPU reduce, and the softmax uses an
    # approx EUP reciprocal, so rounding differs slightly from the monolithic f32
    # reference matmuls.
    assert jnp.allclose(out, ref, atol=2e-2, rtol=2e-2), "mismatch vs reference"

    print("KERNEL_OK")
</pallas_src>

<mosaic_0001>
module attributes {stable_mosaic.version = 11 : i64} {
  func.func @_din_kernel(%arg0: i32, %arg1: memref<8x36xbf16, #tpu.memory_space<vmem>>, %arg2: memref<8x8x36xbf16, #tpu.memory_space<vmem>>, %arg3: memref<8x1x1xi32, #tpu.memory_space<vmem>>, %arg4: memref<3x36x128xbf16, #tpu.memory_space<vmem>>, %arg5: memref<1x128xf32, #tpu.memory_space<vmem>>, %arg6: memref<128x128xbf16, #tpu.memory_space<vmem>>, %arg7: memref<1x128xf32, #tpu.memory_space<vmem>>, %arg8: memref<1x128xf32, #tpu.memory_space<vmem>>, %arg9: memref<1x1xf32, #tpu.memory_space<vmem>>, %arg10: memref<8x36xf32, #tpu.memory_space<vmem>>) attributes {dimension_semantics = [#tpu.dimension_semantics<parallel>], iteration_bounds = array<i64: 1>, scalar_prefetch = 0 : i64, scratch_operands = 0 : i64, tpu.core_type = #tpu.core_type<tc>, window_params = [{transform_indices = @transform_0, window_bounds = array<i64: 8, 36>}, {transform_indices = @transform_1, window_bounds = array<i64: 8, 8, 36>}, {transform_indices = @transform_2, window_bounds = array<i64: 8, 1, 1>}, {pipeline_mode = #tpu.pipeline_mode<synchronous>, transform_indices = @transform_3, window_bounds = array<i64: 3, 36, 128>}, {pipeline_mode = #tpu.pipeline_mode<synchronous>, transform_indices = @transform_4, window_bounds = array<i64: 1, 128>}, {pipeline_mode = #tpu.pipeline_mode<synchronous>, transform_indices = @transform_5, window_bounds = array<i64: 128, 128>}, {pipeline_mode = #tpu.pipeline_mode<synchronous>, transform_indices = @transform_6, window_bounds = array<i64: 1, 128>}, {pipeline_mode = #tpu.pipeline_mode<synchronous>, transform_indices = @transform_7, window_bounds = array<i64: 1, 128>}, {pipeline_mode = #tpu.pipeline_mode<synchronous>, transform_indices = @transform_8, window_bounds = array<i64: 1, 1>}, {transform_indices = @transform_9, window_bounds = array<i64: 8, 36>}]} {
    %c0 = arith.constant 0 : index
    %c0_0 = arith.constant 0 : index
    %0 = vector.load %arg1[%c0, %c0_0] : memref<8x36xbf16, #tpu.memory_space<vmem>>, vector<8x36xbf16>
    %c0_1 = arith.constant 0 : index
    %c0_2 = arith.constant 0 : index
    %c0_3 = arith.constant 0 : index
    %1 = vector.load %arg2[%c0_1, %c0_2, %c0_3] : memref<8x8x36xbf16, #tpu.memory_space<vmem>>, vector<8x8x36xbf16>
    %2 = vector.shape_cast %1 : vector<8x8x36xbf16> to vector<64x36xbf16>
    %c0_4 = arith.constant 0 : index
    %c0_5 = arith.constant 0 : index
    %c0_6 = arith.constant 0 : index
    %3 = vector.load %arg4[%c0_4, %c0_5, %c0_6] : memref<3x36x128xbf16, #tpu.memory_space<vmem>>, vector<1x36x128xbf16>
    %4 = vector.shape_cast %3 : vector<1x36x128xbf16> to vector<36x128xbf16>
    %cst = arith.constant dense<0.000000e+00> : vector<8x128xf32>
    %5 = tpu.matmul %0, %4, %cst {dimension_numbers = #tpu.dot_dimension_numbers<[1], [0], [0], [1], [0, 0, 1, 1], [], []>} : vector<8x36xbf16>, vector<36x128xbf16>, vector<8x128xf32> -> vector<8x128xf32>
    %c1 = arith.constant 1 : index
    %c0_7 = arith.constant 0 : index
    %c0_8 = arith.constant 0 : index
    %6 = vector.load %arg4[%c1, %c0_7, %c0_8] : memref<3x36x128xbf16, #tpu.memory_space<vmem>>, vector<1x36x128xbf16>
    %7 = vector.shape_cast %6 : vector<1x36x128xbf16> to vector<36x128xbf16>
    %cst_9 = arith.constant dense<0.000000e+00> : vector<64x128xf32>
    %8 = tpu.matmul %2, %7, %cst_9 {dimension_numbers = #tpu.dot_dimension_numbers<[1], [0], [0], [1], [0, 0, 1, 1], [], []>} : vector<64x36xbf16>, vector<36x128xbf16>, vector<64x128xf32> -> vector<64x128xf32>
    %9 = vector.shape_cast %0 : vector<8x36xbf16> to vector<8x1x36xbf16>
    %10 = vector.broadcast %9 : vector<8x1x36xbf16> to vector<8x8x36xbf16>
    %11 = arith.mulf %10, %1 : vector<8x8x36xbf16>
    %12 = vector.shape_cast %11 : vector<8x8x36xbf16> to vector<64x36xbf16>
    %c2 = arith.constant 2 : index
    %c0_10 = arith.constant 0 : index
    %c0_11 = arith.constant 0 : index
    %13 = vector.load %arg4[%c2, %c0_10, %c0_11] : memref<3x36x128xbf16, #tpu.memory_space<vmem>>, vector<1x36x128xbf16>
    %14 = vector.shape_cast %13 : vector<1x36x128xbf16> to vector<36x128xbf16>
    %cst_12 = arith.constant dense<0.000000e+00> : vector<64x128xf32>
    %15 = tpu.matmul %12, %14, %cst_12 {dimension_numbers = #tpu.dot_dimension_numbers<[1], [0], [0], [1], [0, 0, 1, 1], [], []>} : vector<64x36xbf16>, vector<36x128xbf16>, vector<64x128xf32> -> vector<64x128xf32>
    %16 = vector.shape_cast %8 : vector<64x128xf32> to vector<8x8x128xf32>
    %17 = vector.shape_cast %15 : vector<64x128xf32> to vector<8x8x128xf32>
    %18 = arith.addf %16, %17 : vector<8x8x128xf32>
    %19 = vector.shape_cast %5 : vector<8x128xf32> to vector<8x1x128xf32>
    %20 = vector.broadcast %19 : vector<8x1x128xf32> to vector<8x8x128xf32>
    %21 = arith.addf %18, %20 : vector<8x8x128xf32>
    %c0_13 = arith.constant 0 : index
    %c0_14 = arith.constant 0 : index
    %22 = vector.load %arg5[%c0_13, %c0_14] : memref<1x128xf32, #tpu.memory_space<vmem>>, vector<1x128xf32>
    %23 = vector.shape_cast %22 : vector<1x128xf32> to vector<1x1x128xf32>
    %24 = vector.broadcast %23 : vector<1x1x128xf32> to vector<8x8x128xf32>
    %25 = arith.addf %21, %24 : vector<8x8x128xf32>
    %cst_15 = arith.constant 5.000000e-01 : f32
    %26 = vector.broadcast %cst_15 : f32 to vector<8x8x128xf32>
    %27 = arith.mulf %26, %25 : vector<8x8x128xf32>
    %28 = math.tanh %27 : vector<8x8x128xf32>
    %cst_16 = arith.constant 1.000000e+00 : f32
    %29 = vector.broadcast %cst_16 : f32 to vector<8x8x128xf32>
    %30 = arith.addf %28, %29 : vector<8x8x128xf32>
    %cst_17 = arith.constant 5.000000e-01 : f32
    %31 = vector.broadcast %cst_17 : f32 to vector<8x8x128xf32>
    %32 = arith.mulf %31, %30 : vector<8x8x128xf32>
    %33 = vector.shape_cast %32 : vector<8x8x128xf32> to vector<64x128xf32>
    %34 = arith.truncf %33 : vector<64x128xf32> to vector<64x128xbf16>
    %c0_18 = arith.constant 0 : index
    %c0_19 = arith.constant 0 : index
    %35 = vector.load %arg6[%c0_18, %c0_19] : memref<128x128xbf16, #tpu.memory_space<vmem>>, vector<128x128xbf16>
    %cst_20 = arith.constant dense<0.000000e+00> : vector<64x128xf32>
    %36 = tpu.matmul %34, %35, %cst_20 {dimension_numbers = #tpu.dot_dimension_numbers<[1], [0], [0], [1], [0, 0, 1, 1], [], []>} : vector<64x128xbf16>, vector<128x128xbf16>, vector<64x128xf32> -> vector<64x128xf32>
    %c0_21 = arith.constant 0 : index
    %c0_22 = arith.constant 0 : index
    %37 = vector.load %arg7[%c0_21, %c0_22] : memref<1x128xf32, #tpu.memory_space<vmem>>, vector<1x128xf32>
    %38 = vector.broadcast %37 : vector<1x128xf32> to vector<64x128xf32>
    %39 = arith.addf %36, %38 : vector<64x128xf32>
    %cst_23 = arith.constant 5.000000e-01 : f32
    %40 = vector.broadcast %cst_23 : f32 to vector<64x128xf32>
    %41 = arith.mulf %40, %39 : vector<64x128xf32>
    %42 = math.tanh %41 : vector<64x128xf32>
    %cst_24 = arith.constant 1.000000e+00 : f32
    %43 = vector.broadcast %cst_24 : f32 to vector<64x128xf32>
    %44 = arith.addf %42, %43 : vector<64x128xf32>
    %cst_25 = arith.constant 5.000000e-01 : f32
    %45 = vector.broadcast %cst_25 : f32 to vector<64x128xf32>
    %46 = arith.mulf %45, %44 : vector<64x128xf32>
    %c0_26 = arith.constant 0 : index
    %c0_27 = arith.constant 0 : index
    %47 = vector.load %arg8[%c0_26, %c0_27] : memref<1x128xf32, #tpu.memory_space<vmem>>, vector<1x128xf32>
    %48 = vector.broadcast %47 : vector<1x128xf32> to vector<64x128xf32>
    %49 = arith.mulf %46, %48 : vector<64x128xf32>
    %cst_28 = arith.constant dense<0.000000e+00> : vector<64xf32>
    %50 = vector.multi_reduction <add>, %49, %cst_28 [1] : vector<64x128xf32> to vector<64xf32>
    %51 = vector.shape_cast %50 : vector<64xf32> to vector<64x1xf32>
    %c0_29 = arith.constant 0 : index
    %c0_30 = arith.constant 0 : index
    %52 = vector.load %arg9[%c0_29, %c0_30] : memref<1x1xf32, #tpu.memory_space<vmem>>, vector<1x1xf32>
    %53 = vector.broadcast %52 : vector<1x1xf32> to vector<64x1xf32>
    %54 = arith.addf %51, %53 : vector<64x1xf32>
    %55 = vector.shape_cast %54 : vector<64x1xf32> to vector<8x8x1xf32>
    %56 = tpu.iota {dimensions = array<i32: 1>} : vector<8x8x1xi32>
    %c0_31 = arith.constant 0 : index
    %c0_32 = arith.constant 0 : index
    %c0_33 = arith.constant 0 : index
    %57 = vector.load %arg3[%c0_31, %c0_32, %c0_33] : memref<8x1x1xi32, #tpu.memory_space<vmem>>, vector<8x1x1xi32>
    %58 = vector.broadcast %57 : vector<8x1x1xi32> to vector<8x8x1xi32>
    %59 = arith.cmpi slt, %56, %58 : vector<8x8x1xi32>
    %60 = arith.extui %59 : vector<8x8x1xi1> to vector<8x8x1xi32>
    %61 = arith.sitofp %60 : vector<8x8x1xi32> to vector<8x8x1xf32>
    %62 = arith.mulf %55, %61 : vector<8x8x1xf32>
    %cst_34 = arith.constant dense<0xFF800000> : vector<8x1xf32>
    %63 = vector.multi_reduction <maximumf>, %62, %cst_34 [1] : vector<8x8x1xf32> to vector<8x1xf32>
    %64 = vector.shape_cast %63 : vector<8x1xf32> to vector<8x1x1xf32>
    %65 = vector.broadcast %64 : vector<8x1x1xf32> to vector<8x8x1xf32>
    %66 = arith.subf %62, %65 : vector<8x8x1xf32>
    %67 = math.exp %66 : vector<8x8x1xf32>
    %cst_35 = arith.constant dense<0.000000e+00> : vector<8x1xf32>
    %68 = vector.multi_reduction <add>, %67, %cst_35 [1] : vector<8x8x1xf32> to vector<8x1xf32>
    %69 = vector.shape_cast %68 : vector<8x1xf32> to vector<8x1x1xf32>
    %70 = tpu.reciprocal %69 {approx = true} : vector<8x1x1xf32> -> vector<8x1x1xf32>
    %71 = vector.broadcast %70 : vector<8x1x1xf32> to vector<8x8x1xf32>
    %72 = arith.mulf %67, %71 : vector<8x8x1xf32>
    %73 = arith.extf %1 : vector<8x8x36xbf16> to vector<8x8x36xf32>
    %74 = vector.broadcast %72 : vector<8x8x1xf32> to vector<8x8x36xf32>
    %75 = arith.mulf %74, %73 : vector<8x8x36xf32>
    %cst_36 = arith.constant dense<0.000000e+00> : vector<8x36xf32>
    %76 = vector.multi_reduction <add>, %75, %cst_36 [1] : vector<8x8x36xf32> to vector<8x36xf32>
    %c0_37 = arith.constant 0 : index
    %c0_38 = arith.constant 0 : index
    %77 = vector.load %arg10[%c0_37, %c0_38] : memref<8x36xf32, #tpu.memory_space<vmem>>, vector<8x36xf32>
    tpu.vector_store %arg10[%c0_37, %c0_38], %76 {strides = array<i32>} : memref<8x36xf32, #tpu.memory_space<vmem>>, vector<8x36xf32>,
    return
  }
  func.func @transform_0(%arg0: i32) -> (i32, i32) {
    %c0_i32 = arith.constant 0 : i32
    %c0_i32_0 = arith.constant 0 : i32
    return %arg0, %c0_i32 : i32, i32
  }
  func.func @transform_1(%arg0: i32) -> (i32, i32, i32) {
    %c0_i32 = arith.constant 0 : i32
    %c0_i32_0 = arith.constant 0 : i32
    %c0_i32_1 = arith.constant 0 : i32
    return %arg0, %c0_i32, %c0_i32_0 : i32, i32, i32
  }
  func.func @transform_2(%arg0: i32) -> (i32, i32, i32) {
    %c0_i32 = arith.constant 0 : i32
    %c0_i32_0 = arith.constant 0 : i32
    %c0_i32_1 = arith.constant 0 : i32
    return %arg0, %c0_i32, %c0_i32_0 : i32, i32, i32
  }
  func.func @transform_3(%arg0: i32) -> (i32, i32, i32) {
    %c0_i32 = arith.constant 0 : i32
    %c0_i32_0 = arith.constant 0 : i32
    %c0_i32_1 = arith.constant 0 : i32
    %c0_i32_2 = arith.constant 0 : i32
    return %c0_i32, %c0_i32_0, %c0_i32_1 : i32, i32, i32
  }
  func.func @transform_4(%arg0: i32) -> (i32, i32) {
    %c0_i32 = arith.constant 0 : i32
    %c0_i32_0 = arith.constant 0 : i32
    %c0_i32_1 = arith.constant 0 : i32
    return %c0_i32, %c0_i32_0 : i32, i32
  }
  func.func @transform_5(%arg0: i32) -> (i32, i32) {
    %c0_i32 = arith.constant 0 : i32
    %c0_i32_0 = arith.constant 0 : i32
    %c0_i32_1 = arith.constant 0 : i32
    return %c0_i32, %c0_i32_0 : i32, i32
  }
  func.func @transform_6(%arg0: i32) -> (i32, i32) {
    %c0_i32 = arith.constant 0 : i32
    %c0_i32_0 = arith.constant 0 : i32
    %c0_i32_1 = arith.constant 0 : i32
    return %c0_i32, %c0_i32_0 : i32, i32
  }
  func.func @transform_7(%arg0: i32) -> (i32, i32) {
    %c0_i32 = arith.constant 0 : i32
    %c0_i32_0 = arith.constant 0 : i32
    %c0_i32_1 = arith.constant 0 : i32
    return %c0_i32, %c0_i32_0 : i32, i32
  }
  func.func @transform_8(%arg0: i32) -> (i32, i32) {
    %c0_i32 = arith.constant 0 : i32
    %c0_i32_0 = arith.constant 0 : i32
    %c0_i32_1 = arith.constant 0 : i32
    return %c0_i32, %c0_i32_0 : i32, i32
  }
  func.func @transform_9(%arg0: i32) -> (i32, i32) {
    %c0_i32 = arith.constant 0 : i32
    %c0_i32_0 = arith.constant 0 : i32
    return %arg0, %c0_i32 : i32, i32
  }
}

</mosaic_0001>

<bundles_post_ra>
// kernel: din_attention.1
= control target key start
LH: loop header
LB: loop body
LE: loop exit
PB: predicated region body
PF: predicated region fallthrough
CT: control target
= control target key end

     0   :  { %vm99_vm0 = vcmask 1041408   ;;  %v1496_v0 = vmov 0.0   ;;  %vm1497_vm1 = vmmov 0   ;;  %v1498_v2 = vmov 1966171168   ;;  %s1866_s3 = inlined_call_operand.vmem [shape: bf16[3,36,128], index: 3, kind: input, shape index: {}]   ;;  %s1867_s0 = inlined_call_operand.vmem [shape: bf16[2,36], index: 0, kind: input, shape index: {}]   ;;  %s1868_s1 = inlined_call_operand.vmem [shape: bf16[2,8,36], index: 1, kind: input, shape index: {}]   ;;  %s1869_s5 = inlined_call_operand.vmem [shape: bf16[128,128], index: 5, kind: input, shape index: {}]   ;;  %s1870_s4 = inlined_call_operand.vmem [shape: f32[1,128], index: 4, kind: input, shape index: {}]   ;;  %s1871_s8 = inlined_call_operand.<no memory space> [shape: f32[1,1], index: 8, kind: input, shape index: {}]   ;;  %s1872_s6 = inlined_call_operand.vmem [shape: f32[1,128], index: 6, kind: input, shape index: {}]   ;;  %s1873_s7 = inlined_call_operand.vmem [shape: f32[1,128], index: 7, kind: input, shape index: {}]   ;;  %s1874_s2 = inlined_call_operand.vmem [shape: s32[2,1,1], index: 2, kind: input, shape index: {}]   ;;  %s1875_s9 = inlined_call_operand.vmem [shape: f32[8,36], index: 9, kind: output, shape index: {}]  }
   0x1   :  { %1333 = vmatprep.subr.bf16.mxu0 %v1496_v0  ;;  %v1403_v1 = vld [vmem:[%s1866_s3 + $0x10] ss:$0 sps:$4 sm:$0x33]   ;;  %1339 = vmatprep.mubr.msk.bf16.mxu0 %vm1497_vm1, %v1496_v0  ;;  %v59_v3 = vunpack.c.l.s4 %v1498_v2  ;;  %v61_v4 = vlaneseq  ;;  %v1404_v6 = vld [vmem:[%s1866_s3 + $0x8] sm:$0xff]   ;;  %v35_v7 = vld [vmem:[%s1867_s0] sm:$0x1] }
   0x2   :  { %v101_v5 = vsel %vm99_vm0, %v1403_v1, 0  ;;  %v36_v9 = vld [vmem:[%s1867_s0 + $0x1] sm:$0x1]  ;;  %v37_v10 = vld [vmem:[%s1867_s0 + $0x2] sm:$0x1]  ;;  %v265_v18 = vunpack.i.h.s16 %v35_v7  ;;  %v1255_v24 = vpack.i.b16 %v35_v7, %v35_v7  ;;  %vm95_vm2 = vcmask 293888  }
   0x3   :  { %v60_v8 = vunpack.c.0.s8 %v59_v3  ;;  %1334 = vmatpush3.bf16.msra.mxu0 %v101_v5  ;;  %v1571_v11 = vld [vmem:[%s1867_s0 + $0x3] sm:$0x1]  ;;  %v56_v12 = vcombine.low %v35_v7, %v36_v9  ;;  %v1575_v14 = vshrl.u32 %v61_v4, 7  ;;  %v1406_v17 = vld [vmem:[%s1866_s3 + $0x24] ss:$0 sps:$4 sm:$0x33]   ;;  %v267_v31 = vunpack.i.h.s16 %v36_v9 }
   0x4   :  { %1335 = vmatprep.subr.bf16.mxu0 %v1496_v0  ;;  %v57_v13 = vcombine.low %v37_v10, %v1571_v11  ;;  %v1405_v16 = vld [vmem:[%s1866_s3] sm:$0xff]   ;;  %v273_v27 = vpack.i.b16 %v265_v18, %v265_v18  ;;  %v197_v29 = vsel %vm99_vm0, %v1406_v17, 0  ;;  %v269_v34 = vunpack.i.h.s16 %v37_v10  ;;  %v1408_v35 = vld [vmem:[%s1866_s3 + $0x14] sm:$0xff]   ;;  %v41_v38 = vld [vmem:[%s1868_s1 + $0x8] sm:$0xf] }
   0x5   :  { %v1578_v15 = vsub.s32 %v60_v8, %v1575_v14  ;;  %v1592_v21 = vld [vmem:[%s1868_s1] sm:$0xf]  ;;  %v1597_v22 = vld [vmem:[%s1868_s1 + $0x4] sm:$0xf]  ;;  %v1600_v25 = vsub.s32 0, %v1575_v14  ;;  %v1256_v36 = vpack.i.b16 %v36_v9, %v36_v9  ;;  %v275_v37 = vpack.i.b16 %v267_v31, %v267_v31  ;;  %v1412_v57 = vld [vmem:[%s1866_s3 + $0x30] sm:$0xff]  }
   0x6   :  { %v1244_v26 = vcombine.low %v1592_v21, %v1597_v22  ;;  %v1407_v30 = vld [vmem:[%s1866_s3 + $0x1c] sm:$0xff]   ;;  %v1257_v39 = vpack.i.b16 %v37_v10, %v37_v10  ;;  %v42_v40 = vld [vmem:[%s1868_s1 + $0xc] sm:$0xf]  ;;  %v1411_v41 = vld [vmem:[%s1866_s3 + $0x38] ss:$0 sps:$4 sm:$0x33]   ;;  %v277_v44 = vpack.i.b16 %v269_v34, %v269_v34  ;;  %v271_v51 = vunpack.i.h.s16 %v1571_v11 }
   0x7   :  { %1336 = vmatpush3.bf16.msra.mxu0 %v1404_v6  ;;  %v64_v19 = vrot.slane %v56_v12, %v1578_v15  ;;  %v71_v20 = vrot.slane %v57_v13, %v1578_v15  ;;  %v283_v32 = vrot.slane %v1255_v24, %v1600_v25  ;;  %v287_v33 = vrot.slane %v273_v27, %v1600_v25  ;;  %v43_v45 = vld [vmem:[%s1868_s1 + $0x10] sm:$0xf]  ;;  %v44_v46 = vld [vmem:[%s1868_s1 + $0x14] sm:$0xf]  ;;  %v45_v63 = vld [vmem:[%s1868_s1 + $0x18] sm:$0xf] }
   0x8   :  { %1337 = vmatprep.subr.bf16.mxu0 %v1496_v0  ;;  %v291_v47 = vrot.slane %v1256_v36, %v1600_v25  ;;  %v295_v48 = vrot.slane %v275_v37, %v1600_v25  ;;  %v1245_v49 = vcombine.low %v41_v38, %v42_v40  ;;  %v299_v50 = vrot.slane %v1257_v39, %v1600_v25  ;;  %v46_v1 = vld [vmem:[%s1868_s1 + $0x1c] sm:$0xf]  ;;  %v1415_v5 = vld [vmem:[%s1866_s3 + $0x28] sm:$0xff]   ;;  %v1417_v31 = vld [vmem:[%s1869_s5 + $0x30] sm:$0xff]  }
   0x9   :  { %v72_v23 = vcombine.low %v64_v19, %v71_v20  ;;  %v313_v42 = vpack.i.b16 %v283_v32, %v283_v32  ;;  %v320_v43 = vpack.i.b16 %v287_v33, %v287_v33  ;;  %v1246_v52 = vcombine.low %v43_v45, %v44_v46  ;;  %v1418_v32 = vld [vmem:[%s1869_s5 + $0x28] sm:$0xff]   ;;  %v1419_v33 = vld [vmem:[%s1869_s5 + $0x20] sm:$0xff]   ;;  %v1420_v34 = vld [vmem:[%s1869_s5 + $0x18] sm:$0xff]  }
   0xa   :  { %v303_v55 = vrot.slane %v277_v44, %v1600_v25  ;;  %v430_v56 = vsel %vm99_vm0, %v1411_v41, 0  ;;  %v327_v58 = vpack.i.b16 %v291_v47, %v291_v47  ;;  %v334_v59 = vpack.i.b16 %v295_v48, %v295_v48  ;;  %v1422_v36 = vld [vmem:[%s1869_s5 + $0x8] sm:$0xff]   ;;  %v1423_v37 = vld [vmem:[%s1869_s5] sm:$0xff]  }
   0xb   :  { %1338 = vmatpush3.bf16.msra.mxu0 %v1405_v16  ;;  %v79_v28 = vrot.slane %v72_v23, %v1578_v15  ;;  %v318_v53 = vrot.slane %v313_v42, %v1600_v25  ;;  %v325_v54 = vrot.slane %v320_v43, %v1600_v25  ;;  %v341_v60 = vpack.i.b16 %v299_v50, %v299_v50 }
   0xc   :  { %1395 = vmatprep.subr.msk.bf16.mxu0 %vm99_vm0, %v1406_v17  ;;  %v1258_v61 = vpack.i.b16 %v1571_v11, %v1571_v11  ;;  %v279_v62 = vpack.i.b16 %v271_v51, %v271_v51  ;;  %v348_v4 = vpack.i.b16 %v303_v55, %v303_v55  ;;  %v332_v6 = vrot.slane %v327_v58, %v1600_v25 }
   0xd   :  { %v368_v2 = vmul.bf16 %v318_v53, %v1592_v21  ;;  %v369_v3 = vmul.bf16 %v325_v54, %v1597_v22  ;;  %v339_v7 = vrot.slane %v334_v59, %v1600_v25  ;;  %v1247_v8 = vcombine.low %v45_v63, %v46_v1 }
   0xe   :  { %1340 = vmatmul.mubr.msk.bf16.vlgmr.msra.gmra.mxu0 %vm95_vm2, %v79_v28  ;;  %v307_v9 = vrot.slane %v1258_v61, %v1600_v25  ;;  %v311_v10 = vrot.slane %v279_v62, %v1600_v25  ;;  %v346_v12 = vrot.slane %v341_v60, %v1600_v25  ;;  %v353_v13 = vrot.slane %v348_v4, %v1600_v25 }
   0xf   :  { %1344 = vmatpush3.bf16.msra.mxu0 %v197_v29  ;;  %1349 = vmatprep.mubr.msk.bf16.mxu0 %vm95_vm2, %v1244_v26  ;;  %v1264_v11 = vcombine.low %v368_v2, %v369_v3  ;;  %v370_v16 = vmul.bf16 %v332_v6, %v41_v38  ;;  %v371_v17 = vmul.bf16 %v339_v7, %v42_v40  ;;  %vm942_vm6 = vcmask 7168  }
  0x10   :  { %1345 = vmatprep.subr.bf16.mxu0 %v1407_v30  ;;  %v355_v18 = vpack.i.b16 %v307_v9, %v307_v9  ;;  %v362_v19 = vpack.i.b16 %v311_v10, %v311_v10  ;;  %v372_v20 = vmul.bf16 %v346_v12, %v43_v45  ;;  %v373_v21 = vmul.bf16 %v353_v13, %v44_v46 }
  0x11   :  { %v1265_v22 = vcombine.low %v370_v16, %v371_v17  ;;  %vm1215_vm12 = vcmask 1041409   ;;  %vm1217_vm13 = vcmask 1042434   ;;  %vm1219_vm14 = vcmask 1043459  }
  0x12   :  { %v360_v23 = vrot.slane %v355_v18, %v1600_v25  ;;  %v367_v24 = vrot.slane %v362_v19, %v1600_v25  ;;  %v1266_v26 = vcombine.low %v372_v20, %v373_v21  ;;  %vm1221_vm15 = vcmask 1044484  }
  0x13   :  { %1346 = vmatpush3.bf16.msra.mxu0 %v1407_v30  ;;  %v1416_v30 = vld [vmem:[%s1869_s5 + $0x38] sm:$0xff]   ;;  %vm1225_vm1 = vcmask 1046534  }
  0x14   :  { %1347 = vmatprep.subr.bf16.mxu0 %v1408_v35  ;;  %v374_v27 = vmul.bf16 %v360_v23, %v45_v63  ;;  %v375_v28 = vmul.bf16 %v367_v24, %v46_v1  ;;  %1371 = vmatprep.subr.bf16.mxu1 %v1416_v30  ;;  %v1275_v63 = vld [vmem:[%s1870_s4] ss:$0 sm:$0xff] }
  0x15   :  { %1372 = vmatpush3.bf16.msra.mxu1 %v1416_v30 }
  0x16   :  { %v1267_v29 = vcombine.low %v374_v27, %v375_v28  ;;  %1373 = vmatprep.subr.bf16.mxu1 %v1417_v31 }
  0x17   :  { %1348 = vmatpush3.bf16.msra.mxu0 %v1408_v35  ;;  %v1421_v35 = vld [vmem:[%s1869_s5 + $0x10] sm:$0xff]  }
  0x18   :  { %1396 = vmatprep.subr.msk.bf16.mxu0 %vm99_vm0, %v1411_v41  ;;  %vm1223_vm0 = vcmask 1045509  }
  0x19   :  { %1374 = vmatpush3.bf16.msra.mxu1 %v1417_v31 }
  0x1a   :  { %1350 = vmatmul.mubr.msk.bf16.vlgmr.msra.gmra.mxu0 %vm95_vm2, %v1245_v49  ;;  %1375 = vmatprep.subr.bf16.mxu1 %v1418_v32 }
  0x1b   :  { %1358 = vmatpush3.bf16.msra.mxu0 %v430_v56  ;;  %1353 = vmatprep.mubr.msk.bf16.mxu0 %vm95_vm2, %v1246_v52 }
  0x1c   :  { %1359 = vmatprep.subr.bf16.mxu0 %v1412_v57 }
  0x1d   :  { %1376 = vmatpush3.bf16.msra.mxu1 %v1418_v32 }
  0x1e   :  { %1377 = vmatprep.subr.bf16.mxu1 %v1419_v33 }
  0x1f   :  { %1360 = vmatpush3.bf16.msra.mxu0 %v1412_v57 }
  0x20   :  { %1361 = vmatprep.subr.bf16.mxu0 %v1415_v5 }
  0x21   :  { %1378 = vmatpush3.bf16.msra.mxu1 %v1419_v33 }
  0x22   :  { %1354 = vmatmul.mubr.msk.bf16.gmra.mxu0 %vm95_vm2, %v1247_v8  ;;  %1379 = vmatprep.subr.bf16.mxu1 %v1420_v34 }
  0x23   :  { %1362 = vmatpush3.bf16.msra.mxu0 %v1415_v5  ;;  %1363 = vmatprep.mubr.msk.bf16.mxu0 %vm95_vm2, %v1264_v11 }
  0x25   :  { %1380 = vmatpush3.bf16.msra.mxu1 %v1420_v34 }
  0x26   :  { %1381 = vmatprep.subr.bf16.mxu1 %v1421_v35 }
  0x29   :  { %1382 = vmatpush3.bf16.msra.mxu1 %v1421_v35 }
  0x2a   :  { %1364 = vmatmul.mubr.msk.bf16.vlgmr.msra.gmra.mxu0 %vm95_vm2, %v1265_v22  ;;  %1383 = vmatprep.subr.bf16.mxu1 %v1422_v36 }
  0x2b   :  { %1367 = vmatprep.mubr.msk.bf16.mxu0 %vm95_vm2, %v1266_v26 }
  0x2d   :  { %1384 = vmatpush3.bf16.msra.mxu1 %v1422_v36 }
  0x2e   :  { %1385 = vmatprep.subr.bf16.mxu1 %v1423_v37 }
  0x31   :  { %1386 = vmatpush3.bf16.msra.mxu1 %v1423_v37 }
  0x32   :  { %1368 = vmatmul.mubr.msk.bf16.gmra.mxu0 %vm95_vm2, %v1267_v29 }
  0xce   :  { %v137_v38 = vpop.f32.mrf.mxu0 }
  0xcf   :  { %v513_v45 = vrot.slane %v137_v38, %v1578_v15  ;;  %v506_v47 = vcombine.high %v137_v38, %v137_v38 }
  0xd0   :  { %v1341_v39 = vpop.f32.mrf.mxu0 }
  0xd1   :  { %v521_v49 = vcombine.high %v513_v45, %v513_v45  ;;  %v529_v50 = vrot.slane %v513_v45, %v1578_v15  ;;  %v520_v52 = vrot.slane %v506_v47, %v1578_v15 }
  0xd2   :  { %v140_v40 = vpop.f32.mrf.mxu0 }
  0xd3   :  { %v543_v54 = vrot.slane %v521_v49, %v1578_v15  ;;  %v551_v55 = vcombine.high %v529_v50, %v529_v50  ;;  %v522_v57 = vcombine.high %v520_v52, %v520_v52  ;;  %v536_v62 = vrot.slane %v520_v52, %v1578_v15 }
  0xd4   :  { %v1342_v41 = vpop.f32.mrf.mxu0  ;;  %v558_v4 = vrot.slane %v529_v50, %v1600_v25 }
  0xd5   :  { %v566_v60 = vrot.slane %v551_v55, %v1600_v25  ;;  %v553_v61 = vcombine.high %v543_v54, %v543_v54  ;;  %v550_v5 = vrot.slane %v522_v57, %v1578_v15  ;;  %v552_v12 = vcombine.high %v536_v62, %v536_v62 }
  0xd6   :  { %v562_v18 = vrot.slane %v543_v54, %v1600_v25  ;;  %v574_v28 = vrot.slane %v536_v62, %v1600_v25 }
  0xd7   :  { %v570_v10 = vrot.slane %v553_v61, %v1600_v25  ;;  %v554_v21 = vcombine.high %v550_v5, %v550_v5  ;;  %v582_v26 = vrot.slane %v552_v12, %v1600_v25  ;;  %v578_v40 = vrot.slane %v550_v5, %v1600_v25 }
  0xd9   :  { %v586_v34 = vrot.slane %v554_v21, %v1600_v25 }
  0xda   :  { %v1351_v42 = vpop.f32.mrf.mxu0 }
  0xdc   :  { %v233_v43 = vpop.f32.mrf.mxu0 }
  0xde   :  { %v1352_v44 = vpop.f32.mrf.mxu0 }
  0xe0   :  { %v236_v46 = vpop.f32.mrf.mxu0 }
  0xe2   :  { %v1355_v48 = vpop.f32.mrf.mxu0 }
  0xe4   :  { %v249_v51 = vpop.f32.mrf.mxu0 }
  0xe6   :  { %v1356_v53 = vpop.f32.mrf.mxu0 }
  0xe8   :  { %v252_v56 = vpop.f32.mrf.mxu0 }
  0xea   :  { %v1365_v58 = vpop.f32.mrf.mxu0 }
  0xeb   :  { %v499_v59 = vadd.f32 %v1365_v58, %v1351_v42 }
  0xec   :  { %v466_v1 = vpop.f32.mrf.mxu0 }
  0xed   :  { %v597_v2 = vadd.f32 %v566_v60, %v499_v59  ;;  %v497_v3 = vadd.f32 %v466_v1, %v233_v43 }
  0xee   :  { %v1366_v6 = vpop.f32.mrf.mxu0 }
  0xef   :  { %v612_v7 = vadd.f32 %v1275_v63, %v597_v2  ;;  %v595_v8 = vadd.f32 %v558_v4, %v497_v3  ;;  %v500_v9 = vadd.f32 %v1366_v6, %v1352_v44 }
  0xf0   :  { %v469_v11 = vpop.f32.mrf.mxu0 }
  0xf1   :  { %v610_v13 = vadd.f32 %v1275_v63, %v595_v8  ;;  %v598_v16 = vadd.f32 %v570_v10, %v500_v9  ;;  %v498_v17 = vadd.f32 %v469_v11, %v236_v46  ;;  %v620_v19 = vmul.f32 0.5, %v612_v7 }
  0xf2   :  { %v1369_v20 = vpop.f32.mrf.mxu0 }
  0xf3   :  { %v618_v22 = vmul.f32 0.5, %v610_v13  ;;  %v613_v23 = vadd.f32 %v1275_v63, %v598_v16  ;;  %v596_v24 = vadd.f32 %v562_v18, %v498_v17  ;;  %v503_v15 = vadd.f32 %v1369_v20, %v1355_v48  ;;  %v1276_v18 = vld [vmem:[%s1872_s6] ss:$0 sm:$0xff] }
  0xf4   :  { %v482_v27 = vpop.f32.mrf.mxu0  ;;  %v14_v17 = vstv %s1871_s8 }
  0xf5   :  { %1424 = vtanh.f32 %v618_v22  ;;  %v621_v29 = vmul.f32 0.5, %v613_v23  ;;  %v611_v30 = vadd.f32 %v1275_v63, %v596_v24  ;;  %v501_v31 = vadd.f32 %v482_v27, %v249_v51  ;;  %15 = vst [vmem:[#allocation2] sm:$0x1] %v14_v17 }
  0xf6   :  { %1426 = vtanh.f32 %v620_v19  ;;  %v601_v32 = vadd.f32 %v582_v26, %v503_v15  ;;  %v1370_v33 = vpop.f32.mrf.mxu0 }
  0xf7   :  { %1428 = vtanh.f32 %v621_v29  ;;  %v619_v35 = vmul.f32 0.5, %v611_v30  ;;  %v599_v36 = vadd.f32 %v574_v28, %v501_v31  ;;  %v504_v37 = vadd.f32 %v1370_v33, %v1356_v53 }
  0xf8   :  { %v616_v38 = vadd.f32 %v1275_v63, %v601_v32  ;;  %v485_v39 = vpop.f32.mrf.mxu0 }
  0xf9   :  { %1430 = vtanh.f32 %v619_v35  ;;  %v614_v41 = vadd.f32 %v1275_v63, %v599_v36  ;;  %v602_v42 = vadd.f32 %v586_v34, %v504_v37  ;;  %v502_v43 = vadd.f32 %v485_v39, %v252_v56 }
  0xfa   :  { %v624_v44 = vmul.f32 0.5, %v616_v38 }
  0xfb   :  { %v622_v45 = vmul.f32 0.5, %v614_v41  ;;  %v617_v46 = vadd.f32 %v1275_v63, %v602_v42  ;;  %v600_v47 = vadd.f32 %v578_v40, %v502_v43 }
  0xfc   :  { %v1729_v17 = vld [vmem:[#allocation2] ss:$0 sm:$0xff] }
  0xfd   :  { %1432 = vtanh.f32 %v622_v45  ;;  %v625_v48 = vmul.f32 0.5, %v617_v46  ;;  %v615_v49 = vadd.f32 %v1275_v63, %v600_v47  ;;  %v1285_v46 = vld [vmem:[%s1873_s7] ss:$0 sm:$0xff] }
  0xfe   :  { %1434 = vtanh.f32 %v624_v44 }
  0xff   :  { %1436 = vtanh.f32 %v625_v48  ;;  %v623_v50 = vmul.f32 0.5, %v615_v49 }
 0x101   :  { %1438 = vtanh.f32 %v623_v50 }
 0x102   :  { %v1425_v51 = vpop.eup %1424 }
 0x103   :  { %v1427_v52 = vpop.eup %1426  ;;  %v634_v54 = vadd.f32 1.0, %v1425_v51 }
 0x104   :  { %v1429_v53 = vpop.eup %1428  ;;  %v636_v57 = vadd.f32 1.0, %v1427_v52 }
 0x105   :  { %v637_v25 = vadd.f32 1.0, %v1429_v53  ;;  %v642_v59 = vmul.f32 0.5, %v634_v54 }
 0x106   :  { %v1431_v55 = vpop.eup %1430  ;;  %v644_v62 = vmul.f32 0.5, %v636_v57 }
 0x107   :  { %v635_v58 = vadd.f32 1.0, %v1431_v55  ;;  %v645_v56 = vmul.f32 0.5, %v637_v25 }
 0x109   :  { %v643_v60 = vmul.f32 0.5, %v635_v58  ;;  %v651_v3 = vpack.c.bf16 %v645_v56, %v644_v62 }
 0x10a   :  { %v1433_v61 = vpop.eup %1432 }
 0x10b   :  { %v1435_v1 = vpop.eup %1434  ;;  %v650_v2 = vpack.c.bf16 %v643_v60, %v642_v59  ;;  %v638_v4 = vadd.f32 1.0, %v1433_v61 }
 0x10c   :  { %v1437_v63 = vpop.eup %1436  ;;  %v640_v7 = vadd.f32 1.0, %v1435_v1 }
 0x10d   :  { %1387 = vmatprep.mubr.bf16.mxu1 %v650_v2  ;;  %v641_v5 = vadd.f32 1.0, %v1437_v63  ;;  %v646_v10 = vmul.f32 0.5, %v638_v4 }
 0x10e   :  { %v1439_v6 = vpop.eup %1438  ;;  %1388 = vmatmul.mubr.bf16.vlgmr.msra.gmra.mxu1 %v651_v3  ;;  %v648_v12 = vmul.f32 0.5, %v640_v7 }
 0x10f   :  { %v639_v8 = vadd.f32 1.0, %v1439_v6  ;;  %v649_v9 = vmul.f32 0.5, %v641_v5 }
 0x111   :  { %v647_v11 = vmul.f32 0.5, %v639_v8  ;;  %v653_v16 = vpack.c.bf16 %v649_v9, %v648_v12  ;;  %v1499_v12 = vmov 0  }
 0x112   :  { %1402 = vset.pattern.permute.xlu1 %v1499_v12  ;;  %1401 = vset.pattern.permute.xlu0 %v1499_v12 }
 0x113   :  { %v652_v13 = vpack.c.bf16 %v647_v11, %v646_v10 }
 0x115   :  { %1391 = vmatprep.mubr.bf16.mxu1 %v652_v13  ;;  %v1289_v13 = vld [vmem:[%s1874_s2 + $0x2] ss:$0 sm:$0xff] }
 0x116   :  { %1392 = vmatmul.mubr.bf16.gmra.mxu1 %v653_v16  ;;  %v1287_v16 = vld [vmem:[%s1874_s2] ss:$0 sm:$0xff]  ;;  %vm912_vm3 = vcmp.lt.s32.totalorder %v1575_v14, %v1289_v13 }
 0x117   :  { %vm910_vm4 = vcmp.lt.s32.totalorder %v1575_v14, %v1287_v16 }
 0x1ce   :  { %v1389_v19 = vpop.f32.mrf.mxu1 }
 0x1cf   :  { %v768_v20 = vadd.f32 %v1389_v19, %v1276_v18  ;;  %v1297_v19 = vsel %vm912_vm3, 1.0, %v1496_v0  ;;  %vm1227_vm3 = vcmask 1047559  }
 0x1d0   :  { %v759_v21 = vpop.f32.mrf.mxu1 }
 0x1d1   :  { %v792_v22 = vmul.f32 0.5, %v768_v20  ;;  %v760_v23 = vadd.f32 %v1276_v18, %v759_v21  ;;  %v1288_v21 = vld [vmem:[%s1874_s2 + $0x1] ss:$0 sm:$0xff] }
 0x1d2   :  { %v1390_v24 = vpop.f32.mrf.mxu1  ;;  %vm911_vm7 = vcmp.lt.s32.totalorder %v1575_v14, %v1288_v21 }
 0x1d3   :  { %1440 = vtanh.f32 %v792_v22  ;;  %v790_v15 = vmul.f32 0.5, %v760_v23  ;;  %v771_v26 = vadd.f32 %v1390_v24, %v1276_v18  ;;  %v1295_v23 = vsel %vm910_vm4, 1.0, %v1496_v0 }
 0x1d4   :  { %v762_v27 = vpop.f32.mrf.mxu1 }
 0x1d5   :  { %1442 = vtanh.f32 %v790_v15  ;;  %v793_v28 = vmul.f32 0.5, %v771_v26  ;;  %v763_v29 = vadd.f32 %v1276_v18, %v762_v27  ;;  %v1291_v27 = vld [vmem:[%s1874_s2 + $0x4] ss:$0 sm:$0xff] }
 0x1d6   :  { %v1393_v30 = vpop.f32.mrf.mxu1  ;;  %vm914_vm8 = vcmp.lt.s32.totalorder %v1575_v14, %v1291_v27 }
 0x1d7   :  { %1444 = vtanh.f32 %v793_v28  ;;  %v791_v31 = vmul.f32 0.5, %v763_v29  ;;  %v784_v32 = vadd.f32 %v1393_v30, %v1276_v18 }
 0x1d8   :  { %v775_v33 = vpop.f32.mrf.mxu1 }
 0x1d9   :  { %1446 = vtanh.f32 %v791_v31  ;;  %v796_v34 = vmul.f32 0.5, %v784_v32  ;;  %v776_v35 = vadd.f32 %v1276_v18, %v775_v33 }
 0x1da   :  { %v1394_v36 = vpop.f32.mrf.mxu1 }
 0x1db   :  { %1448 = vtanh.f32 %v796_v34  ;;  %v794_v37 = vmul.f32 0.5, %v776_v35  ;;  %v787_v38 = vadd.f32 %v1394_v36, %v1276_v18  ;;  %v1296_v34 = vsel %vm911_vm7, 1.0, %v1496_v0  ;;  %v1292_v36 = vld [vmem:[%s1874_s2 + $0x5] ss:$0 sm:$0xff] }
 0x1dc   :  { %v778_v39 = vpop.f32.mrf.mxu1  ;;  %vm915_vm9 = vcmp.lt.s32.totalorder %v1575_v14, %v1292_v36 }
 0x1dd   :  { %1450 = vtanh.f32 %v794_v37  ;;  %v797_v40 = vmul.f32 0.5, %v787_v38  ;;  %v779_v41 = vadd.f32 %v1276_v18, %v778_v39  ;;  %v1290_v18 = vld [vmem:[%s1874_s2 + $0x3] ss:$0 sm:$0xff] }
 0x1de   :  { %vm913_vm5 = vcmp.lt.s32.totalorder %v1575_v14, %v1290_v18 }
 0x1df   :  { %1452 = vtanh.f32 %v797_v40  ;;  %v795_v42 = vmul.f32 0.5, %v779_v41  ;;  %v1298_v28 = vsel %vm913_vm5, 1.0, %v1496_v0  ;;  %v1293_v40 = vld [vmem:[%s1874_s2 + $0x6] ss:$0 sm:$0xff] }
 0x1e0   :  { %v1441_v43 = vpop.eup %1440  ;;  %vm916_vm10 = vcmp.lt.s32.totalorder %v1575_v14, %v1293_v40 }
 0x1e1   :  { %1454 = vtanh.f32 %v795_v42  ;;  %v808_v44 = vadd.f32 1.0, %v1441_v43 }
 0x1e2   :  { %v1443_v45 = vpop.eup %1442 }
 0x1e3   :  { %v816_v47 = vmul.f32 0.5, %v808_v44  ;;  %v806_v48 = vadd.f32 1.0, %v1443_v45  ;;  %v1299_v45 = vsel %vm914_vm8, 1.0, %v1496_v0 }
 0x1e4   :  { %v1445_v49 = vpop.eup %1444 }
 0x1e5   :  { %v831_v50 = vmul.f32 %v1285_v46, %v816_v47  ;;  %v814_v51 = vmul.f32 0.5, %v806_v48  ;;  %v809_v52 = vadd.f32 1.0, %v1445_v49 }
 0x1e6   :  { %v1447_v53 = vpop.eup %1446 }
 0x1e7   :  { %841 = vadd.xlane.f32.xlu1 %v831_v50  ;;  %v829_v54 = vmul.f32 %v1285_v46, %v814_v51  ;;  %v817_v25 = vmul.f32 0.5, %v809_v52  ;;  %v807_v55 = vadd.f32 1.0, %v1447_v53  ;;  %v1294_v50 = vld [vmem:[%s1874_s2 + $0x7] ss:$0 sm:$0xff] }
 0x1e8   :  { %v1449_v57 = vpop.eup %1448  ;;  %vm917_vm11 = vcmp.lt.s32.totalorder %v1575_v14, %v1294_v50 }
 0x1e9   :  { %837 = vadd.xlane.f32.xlu0 %v829_v54  ;;  %v832_v58 = vmul.f32 %v1285_v46, %v817_v25  ;;  %v815_v56 = vmul.f32 0.5, %v807_v55  ;;  %v812_v62 = vadd.f32 1.0, %v1449_v57  ;;  %v1302_v12 = vsel %vm917_vm11, 1.0, %v1496_v0 }
 0x1ea   :  { %v1451_v59 = vpop.eup %1450 }
 0x1eb   :  { %843 = vadd.xlane.f32.xlu1 %v832_v58  ;;  %v830_v60 = vmul.f32 %v1285_v46, %v815_v56  ;;  %v810_v61 = vadd.f32 1.0, %v1451_v59  ;;  %v820_v5 = vmul.f32 0.5, %v812_v62  ;;  %v1300_v58 = vsel %vm915_vm9, 1.0, %v1496_v0 }
 0x1ec   :  { %v1453_v1 = vpop.eup %1452  ;;  %v1301_v56 = vsel %vm916_vm10, 1.0, %v1496_v0 }
 0x1ed   :  { %839 = vadd.xlane.f32.xlu0 %v830_v60  ;;  %v818_v2 = vmul.f32 0.5, %v810_v61  ;;  %v813_v6 = vadd.f32 1.0, %v1453_v1  ;;  %v835_v9 = vmul.f32 %v1285_v46, %v820_v5 }
 0x1ee   :  { %v1455_v63 = vpop.eup %1454 }
 0x1ef   :  { %v833_v3 = vmul.f32 %v1285_v46, %v818_v2  ;;  %v811_v4 = vadd.f32 1.0, %v1455_v63  ;;  %v821_v10 = vmul.f32 0.5, %v813_v6 }
 0x1f1   :  { %845 = vadd.xlane.f32.xlu0 %v833_v3  ;;  %v819_v7 = vmul.f32 0.5, %v811_v4  ;;  %v836_v11 = vmul.f32 %v1285_v46, %v821_v10 }
 0x1f3   :  { %v834_v8 = vmul.f32 %v1285_v46, %v819_v7 }
 0x1f5   :  { %847 = vadd.xlane.f32.xlu1 %v834_v8  ;;  %849 = vadd.xlane.f32.xlu0 %v835_v9 }
 0x1f9   :  { %851 = vadd.xlane.f32.xlu1 %v836_v11 }
 0x270   :  { %v842_v20 = vpop.xlane.xlu1 %841 }
 0x271   :  { %v862_v22 = vadd.f32 %v1729_v17, %v842_v20 }
 0x272   :  { %v838_v24 = vpop.xlane.xlu0 %837 }
 0x273   :  { %v1742_v15 = vmul.f32 %v1297_v19, %v862_v22  ;;  %v860_v26 = vadd.f32 %v1729_v17, %v838_v24 }
 0x274   :  { %v844_v29 = vpop.xlane.xlu1 %843 }
 0x275   :  { %v957_v30 = vsel %vm942_vm6, %v1742_v15, -inf  ;;  %v1752_v31 = vmul.f32 %v1295_v23, %v860_v26  ;;  %v863_v32 = vadd.f32 %v1729_v17, %v844_v29 }
 0x276   :  { %v958_v33 = vrot.slane %v957_v30, 4  ;;  %v840_v35 = vpop.xlane.xlu0 %839 }
 0x277   :  { %v943_v37 = vsel %vm942_vm6, %v1752_v31, -inf  ;;  %v1762_v38 = vmul.f32 %v1298_v28, %v863_v32  ;;  %v861_v39 = vadd.f32 %v1729_v17, %v840_v35 }
 0x278   :  { %v959_v41 = vmax.f32 %v957_v30, %v958_v33  ;;  %v944_v42 = vrot.slane %v943_v37, 4 }
 0x279   :  { %v964_v43 = vsel %vm942_vm6, %v1762_v38, -inf  ;;  %v1770_v44 = vmul.f32 %v1296_v34, %v861_v39 }
 0x27a   :  { %v960_v46 = vrot.slane %v959_v41, 2  ;;  %v945_v47 = vmax.f32 %v943_v37, %v944_v42  ;;  %v965_v48 = vrot.slane %v964_v43, 4  ;;  %v846_v49 = vpop.xlane.xlu0 %845 }
 0x27b   :  { %v950_v51 = vsel %vm942_vm6, %v1770_v44, -inf  ;;  %v864_v52 = vadd.f32 %v1729_v17, %v846_v49 }
 0x27c   :  { %v961_v53 = vmax.f32 %v959_v41, %v960_v46  ;;  %v946_v54 = vrot.slane %v945_v47, 2  ;;  %v966_v25 = vmax.f32 %v964_v43, %v965_v48  ;;  %v951_v55 = vrot.slane %v950_v51, 4 }
 0x27d   :  { %v1781_v57 = vmul.f32 %v1299_v45, %v864_v52 }
 0x27e   :  { %v962_v59 = vrot.slane %v961_v53, 1  ;;  %v947_v60 = vmax.f32 %v945_v47, %v946_v54  ;;  %v967_v61 = vrot.slane %v966_v25, 2  ;;  %v952_v62 = vmax.f32 %v950_v51, %v951_v55  ;;  %v848_v1 = vpop.xlane.xlu1 %847  ;;  %v850_v2 = vpop.xlane.xlu0 %849 }
 0x27f   :  { %v971_v63 = vsel %vm942_vm6, %v1781_v57, -inf  ;;  %v865_v3 = vadd.f32 %v1729_v17, %v848_v1  ;;  %v866_v4 = vadd.f32 %v1729_v17, %v850_v2 }
 0x280   :  { %v963_v5 = vmax.f32 %v961_v53, %v962_v59  ;;  %v948_v6 = vrot.slane %v947_v60, 1  ;;  %v968_v7 = vmax.f32 %v966_v25, %v967_v61  ;;  %v953_v8 = vrot.slane %v952_v62, 2 }
 0x281   :  { %v972_v9 = vrot.slane %v971_v63, 4  ;;  %v939_v10 = vmul.f32 %v1300_v58, %v865_v3  ;;  %v940_v11 = vmul.f32 %v1301_v56, %v866_v4 }
 0x282   :  { %v1001_v13 = vsub.f32 %v1742_v15, %v963_v5  ;;  %v949_v16 = vmax.f32 %v947_v60, %v948_v6  ;;  %v969_v18 = vrot.slane %v968_v7, 1  ;;  %v954_v19 = vmax.f32 %v952_v62, %v953_v8  ;;  %v852_v20 = vpop.xlane.xlu1 %851 }
 0x283   :  { %v973_v21 = vmax.f32 %v971_v63, %v972_v9  ;;  %v978_v22 = vsel %vm942_vm6, %v939_v10, -inf  ;;  %v985_v23 = vsel %vm942_vm6, %v940_v11, -inf  ;;  %v867_v24 = vadd.f32 %v1729_v17, %v852_v20 }
 0x284   :  { %v1011_v26 = vmul.f32 1.442695, %v1001_v13  ;;  %v999_v27 = vsub.f32 %v1752_v31, %v949_v16  ;;  %v970_v28 = vmax.f32 %v968_v7, %v969_v18  ;;  %v955_v29 = vrot.slane %v954_v19, 1 }
 0x285   :  { %v974_v14 = vrot.slane %v973_v21, 2  ;;  %v979_v0 = vrot.slane %v978_v22, 4  ;;  %v986_v30 = vrot.slane %v985_v23, 4  ;;  %v941_v15 = vmul.f32 %v1302_v12, %v867_v24 }
 0x286   :  { %1456 = vpow2.f32 %v1011_v26  ;;  %v1007_v32 = vmul.f32 1.442695, %v999_v27  ;;  %v1002_v33 = vsub.f32 %v1762_v38, %v970_v28  ;;  %v956_v34 = vmax.f32 %v954_v19, %v955_v29 }
 0x287   :  { %v975_v35 = vmax.f32 %v973_v21, %v974_v14  ;;  %v980_v36 = vmax.f32 %v978_v22, %v979_v0  ;;  %v987_v37 = vmax.f32 %v985_v23, %v986_v30  ;;  %v992_v39 = vsel %vm942_vm6, %v941_v15, -inf }
 0x288   :  { %1458 = vpow2.f32 %v1007_v32  ;;  %v1013_v17 = vmul.f32 1.442695, %v1002_v33  ;;  %v1000_v31 = vsub.f32 %v1770_v44, %v956_v34  ;;  %v993_v40 = vrot.slane %v992_v39, 4 }
 0x289   :  { %v976_v41 = vrot.slane %v975_v35, 1  ;;  %v981_v42 = vrot.slane %v980_v36, 2  ;;  %v988_v43 = vrot.slane %v987_v37, 2 }
 0x28a   :  { %1460 = vpow2.f32 %v1013_v17  ;;  %v1009_v45 = vmul.f32 1.442695, %v1000_v31  ;;  %v994_v46 = vmax.f32 %v992_v39, %v993_v40 }
 0x28b   :  { %v977_v47 = vmax.f32 %v975_v35, %v976_v41  ;;  %v982_v48 = vmax.f32 %v980_v36, %v981_v42  ;;  %v989_v38 = vmax.f32 %v987_v37, %v988_v43 }
 0x28c   :  { %1462 = vpow2.f32 %v1009_v45  ;;  %v995_v49 = vrot.slane %v994_v46, 2 }
 0x28d   :  { %v1003_v50 = vsub.f32 %v1781_v57, %v977_v47  ;;  %v983_v51 = vrot.slane %v982_v48, 1  ;;  %v990_v52 = vrot.slane %v989_v38, 1 }
 0x28e   :  { %v996_v53 = vmax.f32 %v994_v46, %v995_v49 }
 0x28f   :  { %v1015_v54 = vmul.f32 1.442695, %v1003_v50  ;;  %v984_v25 = vmax.f32 %v982_v48, %v983_v51  ;;  %v991_v44 = vmax.f32 %v989_v38, %v990_v52 }
 0x290   :  { %v997_v55 = vrot.slane %v996_v53, 1 }
 0x291   :  { %1464 = vpow2.f32 %v1015_v54  ;;  %v1004_v58 = vsub.f32 %v939_v10, %v984_v25  ;;  %v1005_v56 = vsub.f32 %v940_v11, %v991_v44 }
 0x292   :  { %v998_v59 = vmax.f32 %v996_v53, %v997_v55 }
 0x293   :  { %v1802_v60 = vpop.eup %1456  ;;  %v1017_v61 = vmul.f32 1.442695, %v1004_v58  ;;  %v1019_v62 = vmul.f32 1.442695, %v1005_v56 }
 0x294   :  { %v1037_v1 = vsel %vm942_vm6, %v1802_v60, 0.0  ;;  %v1006_v2 = vsub.f32 %v941_v15, %v998_v59 }
 0x295   :  { %v1806_v57 = vpop.eup %1458  ;;  %v1038_v63 = vrot.slane %v1037_v1, 4  ;;  %1466 = vpow2.f32 %v1017_v61 }
 0x296   :  { %v1023_v3 = vsel %vm942_vm6, %v1806_v57, 0.0  ;;  %1468 = vpow2.f32 %v1019_v62  ;;  %v1021_v4 = vmul.f32 1.442695, %v1006_v2 }
 0x297   :  { %v1810_v5 = vpop.eup %1460  ;;  %v1039_v6 = vadd.f32 %v1038_v63, %v1037_v1  ;;  %v1024_v7 = vrot.slane %v1023_v3, 4 }
 0x298   :  { %v1044_v8 = vsel %vm942_vm6, %v1810_v5, 0.0  ;;  %1470 = vpow2.f32 %v1021_v4 }
 0x299   :  { %v1814_v9 = vpop.eup %1462  ;;  %v1025_v10 = vadd.f32 %v1024_v7, %v1023_v3  ;;  %v1045_v11 = vrot.slane %v1044_v8, 4  ;;  %v1040_v12 = vrot.slane %v1039_v6, 2 }
 0x29a   :  { %v1030_v13 = vsel %vm942_vm6, %v1814_v9, 0.0 }
 0x29b   :  { %v1046_v16 = vadd.f32 %v1045_v11, %v1044_v8  ;;  %v1031_v18 = vrot.slane %v1030_v13, 4  ;;  %v1041_v19 = vadd.f32 %v1040_v12, %v1039_v6  ;;  %v1026_v20 = vrot.slane %v1025_v10, 2 }
 0x29d   :  { %v1032_v21 = vadd.f32 %v1031_v18, %v1030_v13  ;;  %v1042_v22 = vrot.slane %v1041_v19, 1  ;;  %v1027_v23 = vadd.f32 %v1026_v20, %v1025_v10  ;;  %v1047_v24 = vrot.slane %v1046_v16, 2 }
 0x29e   :  { %v1818_v26 = vpop.eup %1464 }
 0x29f   :  { %v1051_v27 = vsel %vm942_vm6, %v1818_v26, 0.0  ;;  %v1043_v28 = vadd.f32 %v1042_v22, %v1041_v19  ;;  %v1028_v29 = vrot.slane %v1027_v23, 1  ;;  %v1048_v14 = vadd.f32 %v1047_v24, %v1046_v16  ;;  %v1489_v22 = vld [vmem:[%s1868_s1 + $0x8] sm:$0xf] }
 0x2a0   :  { %v1052_v0 = vrot.slane %v1051_v27, 4  ;;  %v1033_v30 = vrot.slane %v1032_v21, 2 }
 0x2a1   :  { %1472 = vrcp.f32 %v1043_v28  ;;  %v1029_v15 = vadd.f32 %v1028_v29, %v1027_v23  ;;  %v1049_v32 = vrot.slane %v1048_v14, 1  ;;  %v1097_v23 = vunpack.c.l.bf16 %v1489_v22 }
 0x2a2   :  { %v1467_v33 = vpop.eup %1466  ;;  %v1053_v34 = vadd.f32 %v1052_v0, %v1051_v27  ;;  %v1034_v35 = vadd.f32 %v1033_v30, %v1032_v21  ;;  %v1490_v27 = vld [vmem:[%s1868_s1 + $0xc] sm:$0xf] }
 0x2a3   :  { %v1469_v36 = vpop.eup %1468  ;;  %v1058_v37 = vsel %vm942_vm6, %v1467_v33, 0.0  ;;  %1474 = vrcp.f32 %v1029_v15  ;;  %v1050_v39 = vadd.f32 %v1049_v32, %v1048_v14  ;;  %v1098_v28 = vunpack.c.l.bf16 %v1490_v27  ;;  %v1491_v14 = vld [vmem:[%s1868_s1 + $0x4] sm:$0xf] }
 0x2a4   :  { %v1059_v17 = vrot.slane %v1058_v37, 4  ;;  %v1065_v31 = vsel %vm942_vm6, %v1469_v36, 0.0  ;;  %v1035_v40 = vrot.slane %v1034_v35, 1  ;;  %v1054_v41 = vrot.slane %v1053_v34, 2 }
 0x2a5   :  { %v1471_v42 = vpop.eup %1470  ;;  %v1066_v43 = vrot.slane %v1065_v31, 4  ;;  %1476 = vrcp.f32 %v1050_v39  ;;  %v1096_v0 = vunpack.c.l.bf16 %v1491_v14 }
 0x2a6   :  { %v1060_v45 = vadd.f32 %v1059_v17, %v1058_v37  ;;  %v1072_v46 = vsel %vm942_vm6, %v1471_v42, 0.0  ;;  %v1036_v47 = vadd.f32 %v1035_v40, %v1034_v35  ;;  %v1055_v48 = vadd.f32 %v1054_v41, %v1053_v34  ;;  %v1492_v40 = vld [vmem:[%s1868_s1 + $0x18] sm:$0xf] }
 0x2a7   :  { %v1067_v38 = vadd.f32 %v1066_v43, %v1065_v31  ;;  %v1073_v49 = vrot.slane %v1072_v46, 4  ;;  %v1101_v41 = vunpack.c.l.bf16 %v1492_v40 }
 0x2a8   :  { %1478 = vrcp.f32 %v1036_v47  ;;  %v1061_v50 = vrot.slane %v1060_v45, 2  ;;  %v1056_v53 = vrot.slane %v1055_v48, 1 }
 0x2a9   :  { %v1074_v51 = vadd.f32 %v1073_v49, %v1072_v46  ;;  %v1068_v52 = vrot.slane %v1067_v38, 2  ;;  %v1493_v49 = vld [vmem:[%s1868_s1 + $0x10] sm:$0xf] }
 0x2aa   :  { %v1062_v25 = vadd.f32 %v1061_v50, %v1060_v45  ;;  %v1057_v56 = vadd.f32 %v1056_v53, %v1055_v48  ;;  %v1099_v50 = vunpack.c.l.bf16 %v1493_v49 }
 0x2ab   :  { %v1069_v54 = vadd.f32 %v1068_v52, %v1067_v38  ;;  %v1075_v44 = vrot.slane %v1074_v51, 2 }
 0x2ac   :  { %v1063_v62 = vrot.slane %v1062_v25, 1 }
 0x2ad   :  { %v1070_v55 = vrot.slane %v1069_v54, 1  ;;  %v1076_v1 = vadd.f32 %v1075_v44, %v1074_v51 }
 0x2ae   :  { %v1473_v58 = vpop.eup %1472  ;;  %v1064_v6 = vadd.f32 %v1063_v62, %v1062_v25 }
 0x2af   :  { %v1089_v59 = vmul.f32 %v1473_v58, %v1802_v60  ;;  %v1071_v61 = vadd.f32 %v1070_v55, %v1069_v54  ;;  %v1077_v7 = vrot.slane %v1076_v1, 1 }
 0x2b0   :  { %v1475_v2 = vpop.eup %1474 }
 0x2b1   :  { %1115 = vperm.xlu1 %1402, %v1089_v59   ;;  %v1087_v63 = vmul.f32 %v1475_v2, %v1806_v57  ;;  %1480 = vrcp.f32 %v1071_v61  ;;  %v1078_v60 = vadd.f32 %v1077_v7, %v1076_v1 }
 0x2b2   :  { %v1477_v3 = vpop.eup %1476  ;;  %1482 = vrcp.f32 %v1057_v56  ;;  %v1494_v56 = vld [vmem:[%s1868_s1 + $0x14] sm:$0xf] }
 0x2b3   :  { %1105 = vperm.xlu0 %1401, %v1087_v63   ;;  %v1090_v4 = vmul.f32 %v1477_v3, %v1810_v5  ;;  %1484 = vrcp.f32 %v1064_v6  ;;  %v1100_v59 = vunpack.c.l.bf16 %v1494_v56 }
 0x2b4   :  { %1486 = vrcp.f32 %v1078_v60 }
 0x2b5   :  { %v1479_v8 = vpop.eup %1478  ;;  %1120 = vperm.xlu1 %1402, %v1090_v4  }
 0x2b6   :  { %v1088_v10 = vmul.f32 %v1479_v8, %v1814_v9  ;;  %v1488_v9 = vld [vmem:[%s1868_s1] sm:$0xf]  ;;  %v1495_v8 = vld [vmem:[%s1868_s1 + $0x1c] sm:$0xf] }
 0x2b7   :  { %v1095_v20 = vunpack.c.l.bf16 %v1488_v9 }
 0x2b9   :  { %1110 = vperm.xlu1 %1402, %v1088_v10   ;;  %v1102_v10 = vunpack.c.l.bf16 %v1495_v8 }
 0x2be   :  { %v1481_v11 = vpop.eup %1480 }
 0x2bf   :  { %v1093_v12 = vmul.f32 %v1481_v11, %v1469_v36  ;;  %v1483_v13 = vpop.eup %1482 }
 0x2c0   :  { %v1091_v57 = vmul.f32 %v1483_v13, %v1818_v26  ;;  %v1485_v16 = vpop.eup %1484 }
 0x2c1   :  { %1135 = vperm.xlu1 %1402, %v1093_v12   ;;  %v1092_v5 = vmul.f32 %v1485_v16, %v1467_v33  ;;  %v1487_v18 = vpop.eup %1486 }
 0x2c2   :  { %v1094_v19 = vmul.f32 %v1487_v18, %v1471_v42 }
 0x2c5   :  { %1125 = vperm.xlu1 %1402, %v1091_v57  }
 0x2c9   :  { %1130 = vperm.xlu1 %1402, %v1092_v5  }
 0x2cd   :  { %1140 = vperm.xlu1 %1402, %v1094_v19  }
 0x32c   :  { %v1116_v21 = vpop.permute.xlu1 %1115 }
 0x32d   :  { %v1145_v30 = vmul.f32 %v1116_v21, %v1097_v23 }
 0x32e   :  { %v1106_v24 = vpop.permute.xlu0 %1105 }
 0x32f   :  { %v1143_v26 = vmul.f32 %v1106_v24, %v1095_v20  ;;  %v1165_v35 = vsel %vm95_vm2, %v1145_v30, 0.0 }
 0x330   :  { %v1121_v29 = vpop.permute.xlu1 %1120  ;;  %v1166_v31 = vrot.slane %v1165_v35, 4 }
 0x331   :  { %v1151_v15 = vsel %vm95_vm2, %v1143_v26, 0.0  ;;  %v1146_v32 = vmul.f32 %v1121_v29, %v1098_v28 }
 0x332   :  { %v1152_v36 = vrot.slane %v1151_v15, 4  ;;  %v1167_v48 = vadd.f32 %v1166_v31, %v1165_v35 }
 0x333   :  { %v1172_v39 = vsel %vm95_vm2, %v1146_v32, 0.0 }
 0x334   :  { %v1111_v33 = vpop.permute.xlu1 %1110  ;;  %v1153_v42 = vadd.f32 %v1152_v36, %v1151_v15  ;;  %v1173_v45 = vrot.slane %v1172_v39, 4  ;;  %v1168_v44 = vrot.slane %v1167_v48, 2 }
 0x335   :  { %v1144_v34 = vmul.f32 %v1111_v33, %v1096_v0 }
 0x336   :  { %v1154_v51 = vrot.slane %v1153_v42, 2  ;;  %v1174_v52 = vadd.f32 %v1173_v45, %v1172_v39  ;;  %v1169_v4 = vadd.f32 %v1168_v44, %v1167_v48 }
 0x337   :  { %v1158_v37 = vsel %vm95_vm2, %v1144_v34, 0.0 }
 0x338   :  { %v1159_v17 = vrot.slane %v1158_v37, 4  ;;  %v1155_v61 = vadd.f32 %v1154_v51, %v1153_v42  ;;  %v1175_v62 = vrot.slane %v1174_v52, 2  ;;  %v1170_v19 = vrot.slane %v1169_v4, 1 }
 0x33a   :  { %v1160_v43 = vadd.f32 %v1159_v17, %v1158_v37  ;;  %v1156_v60 = vrot.slane %v1155_v61, 1  ;;  %v1176_v12 = vadd.f32 %v1175_v62, %v1174_v52  ;;  %v1171_v0 = vadd.f32 %v1170_v19, %v1169_v4 }
 0x33c   :  { %v1161_v46 = vrot.slane %v1160_v43, 2  ;;  %v1136_v47 = vpop.permute.xlu1 %1135  ;;  %v1157_v21 = vadd.f32 %v1156_v60, %v1155_v61  ;;  %v1177_v24 = vrot.slane %v1176_v12, 1 }
 0x33d   :  { %v1149_v38 = vmul.f32 %v1136_v47, %v1101_v41 }
 0x33e   :  { %v1162_v54 = vadd.f32 %v1161_v46, %v1160_v43  ;;  %v1178_v35 = vadd.f32 %v1177_v24, %v1176_v12 }
 0x33f   :  { %v1193_v53 = vsel %vm95_vm2, %v1149_v38, 0.0 }
 0x340   :  { %v1126_v25 = vpop.permute.xlu1 %1125  ;;  %v1194_v55 = vrot.slane %v1193_v53, 4  ;;  %v1163_v2 = vrot.slane %v1162_v54, 1 }
 0x341   :  { %v1147_v58 = vmul.f32 %v1126_v25, %v1099_v50 }
 0x342   :  { %v1195_v6 = vadd.f32 %v1194_v55, %v1193_v53  ;;  %v1164_v57 = vadd.f32 %v1163_v2, %v1162_v54 }
 0x343   :  { %v1179_v1 = vsel %vm95_vm2, %v1147_v58, 0.0 }
 0x344   :  { %v1180_v63 = vrot.slane %v1179_v1, 4  ;;  %v1131_v3 = vpop.permute.xlu1 %1130  ;;  %v1196_v9 = vrot.slane %v1195_v6, 2  ;;  %v1216_v27 = vsel %vm1215_vm12, %v1164_v57, %v1157_v21 }
 0x345   :  { %v1148_v7 = vmul.f32 %v1131_v3, %v1100_v59  ;;  %v1218_v33 = vsel %vm1217_vm13, %v1171_v0, %v1216_v27 }
 0x346   :  { %v1181_v11 = vadd.f32 %v1180_v63, %v1179_v1  ;;  %v1197_v30 = vadd.f32 %v1196_v9, %v1195_v6  ;;  %v1220_v17 = vsel %vm1219_vm14, %v1178_v35, %v1218_v33 }
 0x347   :  { %v1186_v13 = vsel %vm95_vm2, %v1148_v7, 0.0 }
 0x348   :  { %v1182_v16 = vrot.slane %v1181_v11, 2  ;;  %v1187_v5 = vrot.slane %v1186_v13, 4  ;;  %v1141_v18 = vpop.permute.xlu1 %1140  ;;  %v1198_v39 = vrot.slane %v1197_v30, 1 }
 0x349   :  { %v1150_v20 = vmul.f32 %v1141_v18, %v1102_v10 }
 0x34a   :  { %v1183_v22 = vadd.f32 %v1182_v16, %v1181_v11  ;;  %v1188_v23 = vadd.f32 %v1187_v5, %v1186_v13  ;;  %v1199_v45 = vadd.f32 %v1198_v39, %v1197_v30 }
 0x34b   :  { %v1200_v26 = vsel %vm95_vm2, %v1150_v20, 0.0 }
 0x34c   :  { %v1184_v28 = vrot.slane %v1183_v22, 1  ;;  %v1189_v29 = vrot.slane %v1188_v23, 2  ;;  %v1201_v14 = vrot.slane %v1200_v26, 4 }
 0x34e   :  { %v1190_v15 = vadd.f32 %v1189_v29, %v1188_v23  ;;  %v1202_v32 = vadd.f32 %v1201_v14, %v1200_v26  ;;  %v1185_v34 = vadd.f32 %v1184_v28, %v1183_v22 }
 0x350   :  { %v1191_v36 = vrot.slane %v1190_v15, 1  ;;  %v1203_v37 = vrot.slane %v1202_v32, 2  ;;  %v1222_v41 = vsel %vm1221_vm15, %v1185_v34, %v1220_v17 }
 0x352   :  { %v1192_v31 = vadd.f32 %v1191_v36, %v1190_v15  ;;  %v1204_v40 = vadd.f32 %v1203_v37, %v1202_v32 }
 0x354   :  { %v1224_v42 = vsel %vm1223_vm0, %v1192_v31, %v1222_v41  ;;  %v1205_v43 = vrot.slane %v1204_v40, 1 }
 0x355   :  { %v1226_v47 = vsel %vm1225_vm1, %v1199_v45, %v1224_v42 }
 0x356   :  { %v1206_v46 = vadd.f32 %v1205_v43, %v1204_v40 }
 0x358   :  { %v1228_v48 = vsel %vm1227_vm3, %v1206_v46, %v1226_v47 }
 0x359   :  { %1230 = vst.msk [vmem:[%s1875_s9] sm:$0xff] %vm95_vm2, %v1228_v48 }

</bundles_post_ra>
